<compile_context>
chip_gen: v7x
topology: tpu7x:2x2x1
jax: 0.10.0
libtpu: 0.0.40
codegen_flags: <defaults>
</compile_context>

<pallas_src>
import jax
import jax.numpy as jnp
import numpy as np
from jax.experimental import pallas as pl
from jax.experimental.pallas import tpu as pltpu

_BN_EPS = 1e-5
_LANES = 128


def _make_kernel(seq_len):
    inv_seq = 1.0 / float(seq_len)

    def kernel(h1_ref, h2_ref, uv_ref, out_ref, acc1_ref, acc2_ref):
        s = pl.program_id(1)

        @pl.when(s == 0)
        def _init():
            acc1_ref[...] = jnp.zeros_like(acc1_ref)
            acc2_ref[...] = jnp.zeros_like(acc2_ref)

        # Hot loop: accumulate sequence sums for the mean pool (f32 accum).
        acc1_ref[...] += jnp.sum(h1_ref[...].astype(jnp.float32), axis=1)
        acc2_ref[...] += jnp.sum(h2_ref[...].astype(jnp.float32), axis=1)

        # Finalize once per batch tile, at the last sequence step.
        @pl.when(s == pl.num_programs(1) - 1)
        def _finalize():
            p1 = acc1_ref[...] * inv_seq                       # [TB, H] mean
            p2 = acc2_ref[...] * inv_seq
            # F.normalize(p=2, dim=1): x / max(||x||_2, 1e-12)
            n1 = jnp.sqrt(jnp.sum(p1 * p1, axis=-1, keepdims=True))
            n2 = jnp.sqrt(jnp.sum(p2 * p2, axis=-1, keepdims=True))
            a_n = p1 / jnp.maximum(n1, 1e-12)
            b_n = p2 / jnp.maximum(n2, 1e-12)
            # nn.CosineSimilarity(dim=1, eps=1e-8) on the normalized vectors
            # (exact original formula; runs only once per batch tile).
            num = jnp.sum(a_n * b_n, axis=-1, keepdims=True)   # [TB, 1]
            na = jnp.sqrt(jnp.sum(a_n * a_n, axis=-1, keepdims=True))
            nb = jnp.sqrt(jnp.sum(b_n * b_n, axis=-1, keepdims=True))
            sim = num / jnp.maximum(na * nb, 1e-8)             # [TB, 1]
            # Folded Linear(1,64)->BN(eval)->Linear(64,2): logits = sim*u + v,
            # lane-padded to 128 so the store is dense (slice [:, :2] outside).
            out_ref[...] = sim * uv_ref[0:1, :] + uv_ref[1:2, :]

    return kernel


def fold_tail_params(params):
    """Fold Linear(1,64) -> BatchNorm1d(64, eval) -> Linear(64,2) into
    logits = sim * u + v; u, v in R^2, lane-padded to 128. Returns [2, 128]."""
    w1, b1, gamma, beta, rmean, rvar, w2, b2 = params
    inv_std = 1.0 / jnp.sqrt(rvar + _BN_EPS)
    g = gamma * inv_std                                  # [64]
    scale = w1.reshape(-1) * g                           # per-feature * sim
    shift = b1 * g + (beta - rmean * g)                  # per-feature bias
    u = w2 @ scale                                       # [2]
    v = w2 @ shift + b2                                  # [2]
    u_pad = jnp.zeros((_LANES,), jnp.float32).at[:2].set(u.astype(jnp.float32))
    v_pad = jnp.zeros((_LANES,), jnp.float32).at[:2].set(v.astype(jnp.float32))
    return jnp.stack([u_pad, v_pad], axis=0)             # [2, 128]


def _pick_tile(dim, cap):
    """Largest tile <= cap dividing `dim` that satisfies the (8,128) sublane
    rule (multiple of 8, or the full dim)."""
    if dim <= cap:
        return dim
    t = (cap // 8) * 8
    while t >= 8:
        if dim % t == 0:
            return t
        t -= 8
    return dim  # no suitable divisor: run untiled along this axis


def similarity_head(h1, h2, uv, *, tb=None, ts=None):
    """h1, h2: [B, S, H] (f32 or bf16) last hidden states; uv: [2, 128] folded
    head params. Returns [B, 2] f32 logits."""
    B, S, H = h1.shape
    assert h2.shape == (B, S, H)
    itemsize = jnp.dtype(h1.dtype).itemsize

    if tb is None:
        tb = _pick_tile(B, 8)
    if ts is None:
        # Keep each input block <= ~2 MiB: 2 inputs x 2 pipeline buffers stay
        # well under scoped VMEM on v5e (16 MiB) and v7x (32 MiB default).
        budget = 2 * 1024 * 1024
        cap_s = max(8, budget // max(1, tb * H * itemsize))
        ts = _pick_tile(S, cap_s)
    assert B % tb == 0 and S % ts == 0

    grid = (B // tb, S // ts)
    kernel = _make_kernel(S)

    cost = pl.CostEstimate(
        flops=4 * B * S * H + 10 * B * H,
        transcendentals=4 * B,
        bytes_accessed=2 * B * S * H * itemsize + B * _LANES * 4 + uv.size * 4,
    )

    out_padded = pl.pallas_call(
        kernel,
        out_shape=jax.ShapeDtypeStruct((B, _LANES), jnp.float32),
        grid_spec=pltpu.PrefetchScalarGridSpec(
            num_scalar_prefetch=0,
            grid=grid,
            in_specs=[
                pl.BlockSpec((tb, ts, H), lambda b, s: (b, s, 0)),
                pl.BlockSpec((tb, ts, H), lambda b, s: (b, s, 0)),
                pl.BlockSpec((2, _LANES), lambda b, s: (0, 0)),
            ],
            out_specs=pl.BlockSpec((tb, _LANES), lambda b, s: (b, 0)),
            scratch_shapes=[
                pltpu.VMEM((tb, H), jnp.float32),
                pltpu.VMEM((tb, H), jnp.float32),
            ],
        ),
        compiler_params=pltpu.CompilerParams(
            dimension_semantics=("parallel", "arbitrary"),
        ),
        cost_estimate=cost,
    )(h1, h2, uv)

    return out_padded[:, :2]


def init_params(key):
    """Deterministic params for Sequential(Linear(1,64), BN(64), Linear(64,2))
    in PyTorch layout: (w1[64,1], b1[64], gamma, beta, rmean, rvar, w2[2,64], b2[2])."""
    k1, k2, k3, k4, k5, k6, k7, k8 = jax.random.split(key, 8)
    w1 = jax.random.uniform(k1, (64, 1), jnp.float32, -1.0, 1.0)
    b1 = jax.random.uniform(k2, (64,), jnp.float32, -1.0, 1.0)
    gamma = jax.random.uniform(k3, (64,), jnp.float32, 0.5, 1.5)
    beta = 0.1 * jax.random.normal(k4, (64,), jnp.float32)
    rmean = 0.1 * jax.random.normal(k5, (64,), jnp.float32)
    rvar = jax.random.uniform(k6, (64,), jnp.float32, 0.5, 1.5)
    bound = 1.0 / jnp.sqrt(64.0)
    w2 = jax.random.uniform(k7, (2, 64), jnp.float32, -bound, bound)
    b2 = jax.random.uniform(k8, (2,), jnp.float32, -bound, bound)
    return (w1, b1, gamma, beta, rmean, rvar, w2, b2)


def similarity_head_reference(h1, h2, params):
    """Pure-JAX reference mirroring the PyTorch forward (eval-mode BN)."""
    w1, b1, gamma, beta, rmean, rvar, w2, b2 = params
    p1 = jnp.mean(h1.astype(jnp.float32), axis=1)
    p2 = jnp.mean(h2.astype(jnp.float32), axis=1)
    n1 = jnp.sqrt(jnp.sum(p1 * p1, axis=1, keepdims=True))
    n2 = jnp.sqrt(jnp.sum(p2 * p2, axis=1, keepdims=True))
    a = p1 / jnp.maximum(n1, 1e-12)
    b = p2 / jnp.maximum(n2, 1e-12)
    num = jnp.sum(a * b, axis=1, keepdims=True)
    na = jnp.sqrt(jnp.sum(a * a, axis=1, keepdims=True))
    nb = jnp.sqrt(jnp.sum(b * b, axis=1, keepdims=True))
    sim = num / jnp.maximum(na * nb, 1e-8)
    x = sim @ w1.T + b1[None, :]
    x = (x - rmean) / jnp.sqrt(rvar + _BN_EPS) * gamma + beta
    return x @ w2.T + b2[None, :]


if __name__ == "__main__":
    key = jax.random.PRNGKey(0)
    kp, kh1, kh2 = jax.random.split(key, 3)

    # Stand-ins for the two transformer last hidden states (outputs1[0],
    # outputs2[0]).  bf16 halves the HBM traffic this kernel is bound by.
    B, S, H = 16, 16, 128
    params = init_params(kp)
    uv = fold_tail_params(params)

    h1 = jax.random.normal(kh1, (B, S, H), jnp.float32).astype(jnp.bfloat16)
    h2 = jax.random.normal(kh2, (B, S, H), jnp.float32).astype(jnp.bfloat16)

    # Explicit small tiles so the test exercises the (parallel batch,
    # arbitrary seq) grid and the accumulator init/finalize path: grid=(2, 2).
    logits = similarity_head(h1, h2, uv, tb=8, ts=8)
    jax.block_until_ready(logits)

    ref = similarity_head_reference(h1, h2, params)
    assert logits.shape == (B, 2) and logits.dtype == jnp.float32
    np.testing.assert_allclose(np.asarray(logits), np.asarray(ref),
                               rtol=1e-4, atol=1e-4)
    print("KERNEL_OK")
</pallas_src>

<mosaic_0001>
module attributes {stable_mosaic.version = 11 : i64} {
  func.func @kernel(%arg0: i32, %arg1: i32, %arg2: memref<8x8x128xbf16, #tpu.memory_space<vmem>>, %arg3: memref<8x8x128xbf16, #tpu.memory_space<vmem>>, %arg4: memref<2x128xf32, #tpu.memory_space<vmem>>, %arg5: memref<8x128xf32, #tpu.memory_space<vmem>>, %arg6: memref<8x128xf32, #tpu.memory_space<vmem>>, %arg7: memref<8x128xf32, #tpu.memory_space<vmem>>) attributes {dimension_semantics = [#tpu.dimension_semantics<parallel>, #tpu.dimension_semantics<arbitrary>], iteration_bounds = array<i64: 2, 2>, scalar_prefetch = 0 : i64, scratch_operands = 2 : i64, tpu.core_type = #tpu.core_type<tc>, window_params = [{transform_indices = @transform_0, window_bounds = array<i64: 8, 8, 128>}, {transform_indices = @transform_1, window_bounds = array<i64: 8, 8, 128>}, {pipeline_mode = #tpu.pipeline_mode<synchronous>, transform_indices = @transform_2, window_bounds = array<i64: 2, 128>}, {transform_indices = @transform_3, window_bounds = array<i64: 8, 128>}]} {
    %c0_i32 = arith.constant 0 : i32
    %0 = arith.cmpi eq, %arg1, %c0_i32 : i32
    %1 = arith.extui %0 : i1 to i32
    %c0_i32_0 = arith.constant 0 : i32
    %2 = arith.cmpi ne, %1, %c0_i32_0 : i32
    scf.if %2 {
      %cst_16 = arith.constant 0.000000e+00 : f32
      %18 = vector.broadcast %cst_16 : f32 to vector<8x128xf32>
      %c0_17 = arith.constant 0 : index
      %c0_18 = arith.constant 0 : index
      %19 = vector.load %arg6[%c0_17, %c0_18] : memref<8x128xf32, #tpu.memory_space<vmem>>, vector<8x128xf32>
      tpu.vector_store %arg6[%c0_17, %c0_18], %18 {strides = array<i32>} : memref<8x128xf32, #tpu.memory_space<vmem>>, vector<8x128xf32>,
      %cst_19 = arith.constant 0.000000e+00 : f32
      %20 = vector.broadcast %cst_19 : f32 to vector<8x128xf32>
      %c0_20 = arith.constant 0 : index
      %c0_21 = arith.constant 0 : index
      %21 = vector.load %arg7[%c0_20, %c0_21] : memref<8x128xf32, #tpu.memory_space<vmem>>, vector<8x128xf32>
      tpu.vector_store %arg7[%c0_20, %c0_21], %20 {strides = array<i32>} : memref<8x128xf32, #tpu.memory_space<vmem>>, vector<8x128xf32>,
    } else {
    }
    %c0 = arith.constant 0 : index
    %c0_1 = arith.constant 0 : index
    %3 = vector.load %arg6[%c0, %c0_1] : memref<8x128xf32, #tpu.memory_space<vmem>>, vector<8x128xf32>
    %c0_2 = arith.constant 0 : index
    %c0_3 = arith.constant 0 : index
    %c0_4 = arith.constant 0 : index
    %4 = vector.load %arg2[%c0_2, %c0_3, %c0_4] : memref<8x8x128xbf16, #tpu.memory_space<vmem>>, vector<8x8x128xbf16>
    %5 = arith.extf %4 : vector<8x8x128xbf16> to vector<8x8x128xf32>
    %cst = arith.constant dense<0.000000e+00> : vector<8x128xf32>
    %6 = vector.multi_reduction <add>, %5, %cst [1] : vector<8x8x128xf32> to vector<8x128xf32>
    %7 = arith.addf %3, %6 : vector<8x128xf32>
    %c0_5 = arith.constant 0 : index
    %c0_6 = arith.constant 0 : index
    %8 = vector.load %arg6[%c0_5, %c0_6] : memref<8x128xf32, #tpu.memory_space<vmem>>, vector<8x128xf32>
    tpu.vector_store %arg6[%c0_5, %c0_6], %7 {strides = array<i32>} : memref<8x128xf32, #tpu.memory_space<vmem>>, vector<8x128xf32>,
    %c0_7 = arith.constant 0 : index
    %c0_8 = arith.constant 0 : index
    %9 = vector.load %arg7[%c0_7, %c0_8] : memref<8x128xf32, #tpu.memory_space<vmem>>, vector<8x128xf32>
    %c0_9 = arith.constant 0 : index
    %c0_10 = arith.constant 0 : index
    %c0_11 = arith.constant 0 : index
    %10 = vector.load %arg3[%c0_9, %c0_10, %c0_11] : memref<8x8x128xbf16, #tpu.memory_space<vmem>>, vector<8x8x128xbf16>
    %11 = arith.extf %10 : vector<8x8x128xbf16> to vector<8x8x128xf32>
    %cst_12 = arith.constant dense<0.000000e+00> : vector<8x128xf32>
    %12 = vector.multi_reduction <add>, %11, %cst_12 [1] : vector<8x8x128xf32> to vector<8x128xf32>
    %13 = arith.addf %9, %12 : vector<8x128xf32>
    %c0_13 = arith.constant 0 : index
    %c0_14 = arith.constant 0 : index
    %14 = vector.load %arg7[%c0_13, %c0_14] : memref<8x128xf32, #tpu.memory_space<vmem>>, vector<8x128xf32>
    tpu.vector_store %arg7[%c0_13, %c0_14], %13 {strides = array<i32>} : memref<8x128xf32, #tpu.memory_space<vmem>>, vector<8x128xf32>,
    %c1_i32 = arith.constant 1 : i32
    %15 = arith.cmpi eq, %arg1, %c1_i32 : i32
    %16 = arith.extui %15 : i1 to i32
    %c0_i32_15 = arith.constant 0 : i32
    %17 = arith.cmpi ne, %16, %c0_i32_15 : i32
    scf.if %17 {
      %c0_16 = arith.constant 0 : index
      %c0_17 = arith.constant 0 : index
      %18 = vector.load %arg6[%c0_16, %c0_17] : memref<8x128xf32, #tpu.memory_space<vmem>>, vector<8x128xf32>
      %cst_18 = arith.constant 6.250000e-02 : f32
      %19 = vector.broadcast %cst_18 : f32 to vector<8x128xf32>
      %20 = arith.mulf %18, %19 : vector<8x128xf32>
      %c0_19 = arith.constant 0 : index
      %c0_20 = arith.constant 0 : index
      %21 = vector.load %arg7[%c0_19, %c0_20] : memref<8x128xf32, #tpu.memory_space<vmem>>, vector<8x128xf32>
      %cst_21 = arith.constant 6.250000e-02 : f32
      %22 = vector.broadcast %cst_21 : f32 to vector<8x128xf32>
      %23 = arith.mulf %21, %22 : vector<8x128xf32>
      %24 = arith.mulf %20, %20 : vector<8x128xf32>
      %cst_22 = arith.constant dense<0.000000e+00> : vector<8xf32>
      %25 = vector.multi_reduction <add>, %24, %cst_22 [1] : vector<8x128xf32> to vector<8xf32>
      %26 = vector.shape_cast %25 : vector<8xf32> to vector<8x1xf32>
      %27 = math.sqrt %26 : vector<8x1xf32>
      %28 = arith.mulf %23, %23 : vector<8x128xf32>
      %cst_23 = arith.constant dense<0.000000e+00> : vector<8xf32>
      %29 = vector.multi_reduction <add>, %28, %cst_23 [1] : vector<8x128xf32> to vector<8xf32>
      %30 = vector.shape_cast %29 : vector<8xf32> to vector<8x1xf32>
      %31 = math.sqrt %30 : vector<8x1xf32>
      %cst_24 = arith.constant 9.99999996E-13 : f32
      %32 = vector.broadcast %cst_24 : f32 to vector<8x1xf32>
      %33 = arith.maximumf %27, %32 : vector<8x1xf32>
      %34 = vector.broadcast %33 : vector<8x1xf32> to vector<8x128xf32>
      %35 = arith.divf %20, %34 : vector<8x128xf32>
      %cst_25 = arith.constant 9.99999996E-13 : f32
      %36 = vector.broadcast %cst_25 : f32 to vector<8x1xf32>
      %37 = arith.maximumf %31, %36 : vector<8x1xf32>
      %38 = vector.broadcast %37 : vector<8x1xf32> to vector<8x128xf32>
      %39 = arith.divf %23, %38 : vector<8x128xf32>
      %40 = arith.mulf %35, %39 : vector<8x128xf32>
      %cst_26 = arith.constant dense<0.000000e+00> : vector<8xf32>
      %41 = vector.multi_reduction <add>, %40, %cst_26 [1] : vector<8x128xf32> to vector<8xf32>
      %42 = vector.shape_cast %41 : vector<8xf32> to vector<8x1xf32>
      %43 = arith.mulf %35, %35 : vector<8x128xf32>
      %cst_27 = arith.constant dense<0.000000e+00> : vector<8xf32>
      %44 = vector.multi_reduction <add>, %43, %cst_27 [1] : vector<8x128xf32> to vector<8xf32>
      %45 = vector.shape_cast %44 : vector<8xf32> to vector<8x1xf32>
      %46 = math.sqrt %45 : vector<8x1xf32>
      %47 = arith.mulf %39, %39 : vector<8x128xf32>
      %cst_28 = arith.constant dense<0.000000e+00> : vector<8xf32>
      %48 = vector.multi_reduction <add>, %47, %cst_28 [1] : vector<8x128xf32> to vector<8xf32>
      %49 = vector.shape_cast %48 : vector<8xf32> to vector<8x1xf32>
      %50 = math.sqrt %49 : vector<8x1xf32>
      %51 = arith.mulf %46, %50 : vector<8x1xf32>
      %cst_29 = arith.constant 9.99999993E-9 : f32
      %52 = vector.broadcast %cst_29 : f32 to vector<8x1xf32>
      %53 = arith.maximumf %51, %52 : vector<8x1xf32>
      %54 = arith.divf %42, %53 : vector<8x1xf32>
      %c0_30 = arith.constant 0 : index
      %c0_31 = arith.constant 0 : index
      %55 = vector.load %arg4[%c0_30, %c0_31] : memref<2x128xf32, #tpu.memory_space<vmem>>, vector<1x128xf32>
      %56 = vector.broadcast %54 : vector<8x1xf32> to vector<8x128xf32>
      %57 = vector.broadcast %55 : vector<1x128xf32> to vector<8x128xf32>
      %58 = arith.mulf %56, %57 : vector<8x128xf32>
      %c1 = arith.constant 1 : index
      %c0_32 = arith.constant 0 : index
      %59 = vector.load %arg4[%c1, %c0_32] : memref<2x128xf32, #tpu.memory_space<vmem>>, vector<1x128xf32>
      %60 = vector.broadcast %59 : vector<1x128xf32> to vector<8x128xf32>
      %61 = arith.addf %58, %60 : vector<8x128xf32>
      %c0_33 = arith.constant 0 : index
      %c0_34 = arith.constant 0 : index
      %62 = vector.load %arg5[%c0_33, %c0_34] : memref<8x128xf32, #tpu.memory_space<vmem>>, vector<8x128xf32>
      tpu.vector_store %arg5[%c0_33, %c0_34], %61 {strides = array<i32>} : memref<8x128xf32, #tpu.memory_space<vmem>>, vector<8x128xf32>,
    } else {
    }
    return
  }
  func.func @transform_0(%arg0: i32, %arg1: i32) -> (i32, i32, i32) {
    %c0_i32 = arith.constant 0 : i32
    %c0_i32_0 = arith.constant 0 : i32
    return %arg0, %arg1, %c0_i32 : i32, i32, i32
  }
  func.func @transform_1(%arg0: i32, %arg1: i32) -> (i32, i32, i32) {
    %c0_i32 = arith.constant 0 : i32
    %c0_i32_0 = arith.constant 0 : i32
    return %arg0, %arg1, %c0_i32 : i32, i32, i32
  }
  func.func @transform_2(%arg0: i32, %arg1: i32) -> (i32, i32) {
    %c0_i32 = arith.constant 0 : i32
    %c0_i32_0 = arith.constant 0 : i32
    %c0_i32_1 = arith.constant 0 : i32
    return %c0_i32, %c0_i32_0 : i32, i32
  }
  func.func @transform_3(%arg0: i32, %arg1: i32) -> (i32, i32) {
    %c0_i32 = arith.constant 0 : i32
    %c0_i32_0 = arith.constant 0 : i32
    return %arg0, %c0_i32 : i32, i32
  }
}

</mosaic_0001>

<bundles_post_ra>
// kernel: tpu_custom_call.1
= control target key start
LH: loop header
LB: loop body
LE: loop exit
PB: predicated region body
PF: predicated region fallthrough
CT: control target
= control target key end

     0   :  { %s1343_s0 = inlined_call_operand.hbm [shape: bf16[16,16,128], index: 0, kind: input, shape index: {}]   ;;  %s1344_s1 = inlined_call_operand.hbm [shape: bf16[16,16,128], index: 1, kind: input, shape index: {}]   ;;  %s1345_s2 = inlined_call_operand.vmem [shape: f32[2,128], index: 2, kind: input, shape index: {}]   ;;  %s1346_s3 = inlined_call_operand.hbm [shape: f32[16,128], index: 3, kind: output, shape index: {}]  }
   0x1   :  { %1356 = sst [smem:[#allocation19_spill]] %s1343_s0 }
   0x2   :  { %8 = vsyncpa [#allocation5], 0 }
   0x3   :  { %10 = vsyncpa [#allocation5 + $0x1], 0 }
   0x4   :  { %11 = vsyncpa [#allocation8], 0 }
   0x5   :  { %13 = vsyncpa [#allocation8 + $0x1], 0 }
   0x6   :  { %14 = vsyncpa [#allocation6], 0 }
   0x7   :  { %16 = vsyncpa [#allocation6 + $0x1], 0  ;;  %s1030_s12 = smov 0   ;;  %s1032_s13 = smov 0  }
   0x8   :  { %s1034_s14 = smov 0   ;;  %s1036_s15 = smov 0  }
   0x9   :  { %s1038_s16 = smov 0   ;;  %s1040_s17 = smov 0  }
   0xa   :  { %s1042_s18 = smov 0   ;;  %s1044_s19 = smov 0  }
   0xb   :  { %s1046_s20 = smov 0   ;;  %s1048_s21 = smov 0  }
   0xc   :  { %s1050_s22 = smov 0  }
   0xd LB: > { %1357 = sst [smem:[#allocation13_spill]] %s981_s17  ;;  %s626_s23 = sadd.s32 4294967295, %s1001_s22   ;;  %s1001_s22 = sphi %s1050_s22, %s22_s22   ;;  %s997_s21 = sphi %s1048_s21, %s1381_s21   ;;  %s993_s20 = sphi %s1046_s20, %s1380_s20   ;;  %s989_s19 = sphi %s1044_s19, %s1379_s19   ;;  %s985_s18 = sphi %s1042_s18, %s1378_s18   ;;  %s981_s17 = sphi %s1040_s17, %s1377_s17   ;;  %s977_s16 = sphi %s1038_s16, %s1386_s16   ;;  %s973_s15 = sphi %s1036_s15, %s1385_s15   ;;  %s969_s14 = sphi %s1034_s14, %s1384_s14   ;;  %s965_s13 = sphi %s1032_s13, %s1383_s13   ;;  %s961_s12 = sphi %s1030_s12, %s1382_s12  }
   0xe   : > { %1358 = sst [smem:[#allocation14_spill]] %s993_s20  ;;  %s627_s24 = sadd.s32 4294967294, %s1001_s22  }
   0xf   : > { %1359 = sst [smem:[#allocation15_spill]] %s997_s21  ;;  %s31_s25 = sadd.s32 1, %s993_s20 }
  0x10   : > { %s34_s26 = sadd.s32 1, %s997_s21  ;;  %p32_p0 = scmp.ge.s32.totalorder %s31_s25, 2 }
  0x11   : > { %s43_s27 = sadd.s32 1, %s981_s17  ;;  %p50_p1 = scmp.ne.s32.totalorder %s981_s17, %s977_s16 }
  0x12   : > { %p51_p2 = scmp.eq.s32.totalorder %s1001_s22, 0  ;;  %s1388_s25 = smov (%p32_p0, %s31_s25), 0 }
  0x13   : > { %1360 = sst [smem:[#allocation16_spill]] %s1388_s25  ;;  %s1390_s26 = smov (!%p32_p0, %s34_s26), %s997_s21 }
  0x14   : > { %s39_s28 = ssub.s32 %s993_s20, %s1388_s25  ;;  %p1096_p3 = por %p51_p2, %p50_p1 }
  0x15   : > { %p36_p4 = scmp.ge.s32.totalorder %s1390_s26, 2  ;;  %p56_p5 = scmp.ne.s32.totalorder %s977_s16, %s973_s15 }
  0x16   : > { %p57_p6 = scmp.eq.s32.totalorder %s626_s23, 0  ;;  %s118_s30 = sadd.s32 1, %s969_s14 }
  0x17   : > { %s1392_s26 = smov (%p36_p4, %s1390_s26), 0  ;;  %p128_p8 = scmp.ne.s32.totalorder %s969_s14, %s965_s13 }
  0x18   : > { %1362 = sst [smem:[#allocation17_spill]] %s1392_s26  ;;  %p1104_p7 = por %p57_p6, %p56_p5 }
  0x19   : > { %s38_s5 = ssub.s32 %s997_s21, %s1392_s26  ;;  %p129_p9 = scmp.eq.s32.totalorder %s626_s23, 3 }
  0x1a   : > { %s1363_s4 = scalar_select %p1104_p7, 1, 0 }
  0x1b   : > { %s40_s6 = sor.u32 %s39_s28, %s38_s5  ;;  %p116_p10 = scmp.eq.s32.totalorder %s38_s5, 0 }
  0x1c   : > { %p41_p11 = scmp.eq.s32.totalorder %s40_s6, 0  ;;  %p1112_p12 = por %p129_p9, %p128_p8 }
  0x1d   : > { %s1117_s8 = scalar_select %p116_p10, %s969_s14, %s118_s30  }
  0x1e   : > { %s1364_s7 = scalar_select %p1112_p12, 1, 0 }
  0x1f   : > { %s1120_s9 = scalar_select %p41_p11, %s981_s17, %s43_s27  }
  0x20   : > { %p134_p13 = scmp.ne.s32.totalorder %s965_s13, %s961_s12  ;;  %p135_p0 = scmp.eq.s32.totalorder %s627_s24, 3 }
  0x21   : > { %1365 = sst [smem:[#allocation18_spill]] %s1120_s9  ;;  %p707_p1 = scmp.lt.s32.totalorder %s1001_s22, 4 }
  0x22   : > { %p1125_p2 = por %p135_p0, %p134_p13  ;;  %s1130_s11 = sand.u32 1, %s981_s17  }
  0x23   : > { %s1348_s15 = sshll.u32 %s1130_s11, 5  ;;  %s650_s23 = sshll.u32 %s997_s21, 4 }
  0x24   : > { %s1366_s10 = scalar_select %p1125_p2, 1, 0 }
  0x25   : > { %s1135_s28 = sadd.s32 %s993_s20, %s650_s23  ;;  %s162_s27 = scalar_lea.vmem [#allocation4], %s1348_s15 }
  0x26   : > { %s171_s30 = sshll.u32 %s162_s27, 4  ;;  %s1349_s24 = sshll.u32 %s1135_s28, 6  ;;  %s1140_s30 = int_to_ptr.vmem [resolvable:$true] %s171_s30 }
  0x27   : > { %s1367_s0 = sld [smem:[#allocation19_spill]]  ;;  %p1151_p4 = pnand %p707_p1, %p1096_p3 }
  0x29   : > { %p817_p6 = pneg %p1151_p4 }
  0x2d   : > { %s1147_s26 = scalar_lea.hbm %s1367_s0, %s1349_s24  ;;  %s820_s6 = scalar_lea.hbm %s1367_s0, 2048 }
  0x2e   : > { %s815_s15 = scalar_lea.hbm %s1147_s26, 512  ;;  %p821_p3 = scmp.lt.u32.totalorder %s1147_s26, %s1367_s0 }
  0x2f   : > { %p816_p5 = scmp.ne.s32.totalorder %s1147_s26, %s815_s15  ;;  %p822_p10 = scmp.lt.u32.totalorder %s820_s6, %s815_s15 }
  0x30   : > { %p824_p13 = scmp.lt.u32.totalorder %s815_s15, %s1147_s26 }
  0x31   : > { %p818_p8 = pnand %p817_p6, %p816_p5  ;;  %p823_p11 = por %p822_p10, %p821_p3 }
  0x33   : > { %p819_p9 = pneg %p818_p8  ;;  %p825_p0 = por %p824_p13, %p823_p11 }
  0x35   : > { %p826_p1 = pnand %p825_p0, %p819_p9 }
  0x37   : > { %829 = shalt.err (!%p826_p1)
}
  0x38   : > { %s830_s27 = scalar_lea.vmem %s1140_s30, 512  ;;  %s1003_s29 = smov [#allocation4]  }
  0x39   : > { %p831_p5 = scmp.ne.s32.totalorder %s1140_s30, %s830_s27  ;;  %s835_s5 = sshll.u32 %s1003_s29, 4  ;;  %s836_s5 = int_to_ptr.vmem [resolvable:$false] %s835_s5 }
  0x3a   : > { %s837_s25 = scalar_lea.vmem %s836_s5, 1024  ;;  %p838_p12 = scmp.lt.s32.totalorder %s1140_s30, %s836_s5 }
  0x3b   : > { %p833_p8 = pnand %p831_p5, %p817_p6  ;;  %p839_p3 = scmp.lt.s32.totalorder %s837_s25, %s830_s27 }
  0x3d   : > { %p834_p2 = pneg %p833_p8  ;;  %p840_p10 = por %p839_p3, %p838_p12 }
  0x3f   : > { %p841_p11 = pnand %p840_p10, %p834_p2 }
  0x41   : > { %844 = shalt.err (!%p841_p11)
}
  0x42   : > { %s1004_s15 = smov 128   ;;  %s1005_s24 = smov 64  }
  0x43   : > { %s1006_s6 = smov 4   ;;  %s1369_s27 = scalar_lea.sflag [#allocation5], %s1130_s11 }
  0x44   : > { %699 = dma.hbm_to_vmem [thread:$0]  (!%p1151_p4), %s1147_s26, 512, %s1140_s30, %s1369_s27, %s1004_s15, %s1005_s24, %s1006_s6  }
  0x45   : > { %p638_p12 = scmp.ge.s32.totalorder %s1001_s22, 1  ;;  %p202_p2 = scmp.lt.s32.totalorder %s1001_s22, 5 }
  0x46   : > { %s1371_s5 = sshll.u32 %s1135_s28, 6  ;;  %s1372_s20 = sshll.u32 %s1130_s11, 5 }
  0x47   : > { %p1188_p9 = pnand %p638_p12, %p202_p2  ;;  %s1197_s21 = scalar_lea.hbm %s1344_s1, %s1371_s5 }
  0x48   : > { %s185_s9 = scalar_lea.vmem [#allocation7], %s1372_s20  ;;  %s182_s26 = scalar_lea.sflag [#allocation8], %s1130_s11 }
  0x49   : > { %s194_s17 = sshll.u32 %s185_s9, 4  ;;  %s845_s30 = scalar_lea.hbm %s1197_s21, 512  ;;  %s1201_s17 = int_to_ptr.vmem [resolvable:$true] %s194_s17 }
  0x4a   : > { %p846_p13 = scmp.ne.s32.totalorder %s1197_s21, %s845_s30  ;;  %s850_s27 = scalar_lea.hbm %s1344_s1, 2048 }
  0x4b   : > { %p851_p5 = scmp.lt.u32.totalorder %s1197_s21, %s1344_s1  ;;  %p852_p8 = scmp.lt.u32.totalorder %s850_s27, %s845_s30 }
  0x4c   : > { %p848_p0 = pnand %p846_p13, %p817_p6  ;;  %p854_p10 = scmp.lt.u32.totalorder %s845_s30, %s1197_s21 }
  0x4d   : > { %p853_p3 = por %p852_p8, %p851_p5 }
  0x4e   : > { %p849_p1 = pneg %p848_p0 }
  0x4f   : > { %p855_p11 = por %p854_p10, %p853_p3 }
  0x51   : > { %p856_p12 = pnand %p855_p11, %p849_p1 }
  0x53   : > { %859 = shalt.err (!%p856_p12)
}
  0x54   : > { %s860_s20 = scalar_lea.vmem %s1201_s17, 512  ;;  %s1007_s9 = smov [#allocation7]  }
  0x55   : > { %p861_p2 = scmp.ne.s32.totalorder %s1201_s17, %s860_s20  ;;  %s865_s28 = sshll.u32 %s1007_s9, 4  ;;  %s866_s28 = int_to_ptr.vmem [resolvable:$false] %s865_s28 }
  0x56   : > { %s867_s0 = scalar_lea.vmem %s866_s28, 1024  ;;  %p868_p7 = scmp.lt.s32.totalorder %s1201_s17, %s866_s28 }
  0x57   : > { %p863_p13 = pnand %p861_p2, %p817_p6  ;;  %p869_p5 = scmp.lt.s32.totalorder %s867_s0, %s860_s20 }
  0x59   : > { %p864_p0 = pneg %p863_p13  ;;  %p870_p8 = por %p869_p5, %p868_p7 }
  0x5b   : > { %p871_p3 = pnand %p870_p8, %p864_p0 }
  0x5d   : > { %874 = shalt.err (!%p871_p3)
}
  0x5e   : > { %702 = dma.hbm_to_vmem [thread:$0]  (!%p1151_p4), %s1197_s21, 512, %s1201_s17, %s182_s26, %s1004_s15, %s1005_s24, %s1006_s6  }
  0x5f   : > { %206 = sbr.rel (%p1188_p9) target bundleno = 544 (0x220), region = 32  ;;  %s208_s30 = sand.u32 (!%p1188_p9), 1, %s977_s16  }
  0x60   : > { %s639_s27 = sshll.u32 (!%p1188_p9), %s208_s30, 5  ;;  %s209_s5 = scalar_lea.sflag (!%p1188_p9), [#allocation5], %s208_s30 }
  0x61   : > { %s212_s25 = scalar_lea.vmem (!%p1188_p9), [#allocation4], %s639_s27  ;;  %p1373_p7 = scmp.ne.s32.totalorder (!%p1188_p9), %s1363_s4, 0 }
  0x66   : > { %948 = dma.done.wait (%p1373_p7), %s209_s5, 512  }
  0x67   : > { %950 = vsyncadd (%p1373_p7), %s209_s5, 4294966784  ;;  %s218_s23 = scalar_lea.sflag [#allocation8], %s208_s30  ;;  %s1239_s11 = scalar_lea.vmem [#allocation7], %s639_s27 }
  0x68   : > { %952 = dma.done.wait (%p1373_p7), %s218_s23, 512  }
  0x69   : > { %954 = vsyncadd (%p1373_p7), %s218_s23, 4294966784  ;;  %s246_s17 = sand.u32 1, %s965_s13   ;;  %p642_p4 = scmp.ne.s32.totalorder %s985_s18, 0 }
  0x6a   : > { %s1248_s21 = sshll.u32 %s246_s17, 3  ;;  %v1008_v0 = vmov (!%p642_p4), 0.0  }
  0x6b   : > { %s248_s15 = scalar_lea.vmem [#allocation9], %s1248_s21  ;;  %254 = sbr.rel (%p642_p4) target bundleno = 114 (0x72), region = 44  ;;  %255 = vst [vmem:[#allocation2] sm:$0xff] (!%p642_p4), %v1008_v0  ;;  %256 = vst [vmem:[#allocation3] sm:$0xff] (!%p642_p4), %v1008_v0 }
  0x72 PF: > { %v653_v1 = vld [vmem:[%s212_s25] sm:$0xff]   ;;  %v684_v2 = vld [vmem:[%s212_s25 + $0x8] sm:$0xff]   ;;  %v685_v7 = vld [vmem:[%s212_s25 + $0x10] sm:$0xff]   ;;  %vm330_vm0 = vcmask 1041409   ;;  %vm332_vm1 = vcmask 1042434   ;;  %vm334_vm2 = vcmask 1043459  }
  0x73   : > { %v654_v3 = vunpack.c.l.bf16 %v653_v1  ;;  %v655_v4 = vunpack.c.h.bf16 %v653_v1  ;;  %v658_v5 = vunpack.c.l.bf16 %v684_v2  ;;  %v659_v6 = vunpack.c.h.bf16 %v684_v2  ;;  %v686_v8 = vld [vmem:[%s212_s25 + $0x18] sm:$0xff]   ;;  %v669_v57 = vld [vmem:[%s1239_s11] sm:$0xff]   ;;  %v687_v62 = vld [vmem:[%s1239_s11 + $0x8] sm:$0xff]   ;;  %p643_p6 = scmp.ne.s32.totalorder %s985_s18, 1 }
  0x74   : > { %v662_v9 = vunpack.c.l.bf16 %v685_v7  ;;  %v663_v10 = vunpack.c.h.bf16 %v685_v7  ;;  %v666_v11 = vunpack.c.l.bf16 %v686_v8  ;;  %v667_v12 = vunpack.c.h.bf16 %v686_v8  ;;  %v688_v63 = vld [vmem:[%s1239_s11 + $0x10] sm:$0xff]   ;;  %v689_v1 = vld [vmem:[%s1239_s11 + $0x18] sm:$0xff]  }
  0x75   : > { %v274_v13 = vrot.slane %v654_v3, 4  ;;  %v280_v14 = vrot.slane %v655_v4, 4  ;;  %v286_v15 = vrot.slane %v658_v5, 4  ;;  %v292_v16 = vrot.slane %v659_v6, 4 }
  0x76   : > { %v298_v17 = vrot.slane %v662_v9, 4  ;;  %v304_v18 = vrot.slane %v663_v10, 4  ;;  %v310_v19 = vrot.slane %v666_v11, 4  ;;  %v316_v20 = vrot.slane %v667_v12, 4 }
  0x77   : > { %v275_v21 = vadd.f32 %v654_v3, %v274_v13  ;;  %v281_v22 = vadd.f32 %v655_v4, %v280_v14  ;;  %v287_v23 = vadd.f32 %v658_v5, %v286_v15  ;;  %v293_v24 = vadd.f32 %v659_v6, %v292_v16  ;;  %v257_v13 = vld [vmem:[#allocation2] sm:$0xff] }
  0x78   : > { %v299_v25 = vadd.f32 %v662_v9, %v298_v17  ;;  %v305_v26 = vadd.f32 %v663_v10, %v304_v18  ;;  %v311_v27 = vadd.f32 %v666_v11, %v310_v19  ;;  %v317_v28 = vadd.f32 %v667_v12, %v316_v20 }
  0x79   : > { %v276_v29 = vrot.slane %v275_v21, 2  ;;  %v282_v30 = vrot.slane %v281_v22, 2  ;;  %v288_v31 = vrot.slane %v287_v23, 2  ;;  %v294_v32 = vrot.slane %v293_v24, 2 }
  0x7a   : > { %v300_v33 = vrot.slane %v299_v25, 2  ;;  %v306_v34 = vrot.slane %v305_v26, 2  ;;  %v312_v35 = vrot.slane %v311_v27, 2  ;;  %v318_v36 = vrot.slane %v317_v28, 2 }
  0x7b   : > { %v277_v37 = vadd.f32 %v276_v29, %v275_v21  ;;  %v283_v38 = vadd.f32 %v282_v30, %v281_v22  ;;  %v289_v39 = vadd.f32 %v288_v31, %v287_v23  ;;  %v295_v40 = vadd.f32 %v294_v32, %v293_v24 }
  0x7c   : > { %v301_v41 = vadd.f32 %v300_v33, %v299_v25  ;;  %v307_v42 = vadd.f32 %v306_v34, %v305_v26  ;;  %v313_v43 = vadd.f32 %v312_v35, %v311_v27  ;;  %v319_v44 = vadd.f32 %v318_v36, %v317_v28 }
  0x7d   : > { %v278_v45 = vrot.slane %v277_v37, 1  ;;  %v284_v46 = vrot.slane %v283_v38, 1  ;;  %v290_v47 = vrot.slane %v289_v39, 1  ;;  %v296_v48 = vrot.slane %v295_v40, 1 }
  0x7e   : > { %v302_v49 = vrot.slane %v301_v41, 1  ;;  %v308_v50 = vrot.slane %v307_v42, 1  ;;  %v314_v51 = vrot.slane %v313_v43, 1  ;;  %v320_v52 = vrot.slane %v319_v44, 1 }
  0x7f   : > { %v279_v53 = vadd.f32 %v278_v45, %v277_v37  ;;  %v285_v54 = vadd.f32 %v284_v46, %v283_v38  ;;  %v291_v55 = vadd.f32 %v290_v47, %v289_v39  ;;  %v297_v56 = vadd.f32 %v296_v48, %v295_v40 }
  0x80   : > { %v303_v58 = vadd.f32 %v302_v49, %v301_v41  ;;  %v309_v59 = vadd.f32 %v308_v50, %v307_v42  ;;  %v315_v60 = vadd.f32 %v314_v51, %v313_v43  ;;  %v321_v61 = vadd.f32 %v320_v52, %v319_v44 }
  0x81   : > { %v331_v0 = vsel %vm330_vm0, %v285_v54, %v279_v53  ;;  %vm336_vm3 = vcmask 1044484   ;;  %vm338_vm4 = vcmask 1045509   ;;  %vm340_vm5 = vcmask 1046534  }
  0x82   : > { %v333_v2 = vsel %vm332_vm1, %v291_v55, %v331_v0  ;;  %vm342_vm6 = vcmask 1047559   ;;  %v670_v3 = vunpack.c.l.bf16 %v669_v57  ;;  %v671_v4 = vunpack.c.h.bf16 %v669_v57 }
  0x83   : > { %v335_v5 = vsel %vm334_vm2, %v297_v56, %v333_v2  ;;  %v674_v6 = vunpack.c.l.bf16 %v687_v62  ;;  %v675_v7 = vunpack.c.h.bf16 %v687_v62  ;;  %v678_v8 = vunpack.c.l.bf16 %v688_v63 }
  0x84   : > { %v337_v9 = vsel %vm336_vm3, %v303_v58, %v335_v5  ;;  %v679_v10 = vunpack.c.h.bf16 %v688_v63  ;;  %v682_v11 = vunpack.c.l.bf16 %v689_v1  ;;  %v683_v12 = vunpack.c.h.bf16 %v689_v1 }
  0x85   : > { %v339_v14 = vsel %vm338_vm4, %v309_v59, %v337_v9  ;;  %v364_v15 = vrot.slane %v670_v3, 4  ;;  %v370_v16 = vrot.slane %v671_v4, 4  ;;  %v376_v17 = vrot.slane %v674_v6, 4 }
  0x86   : > { %v341_v18 = vsel %vm340_vm5, %v315_v60, %v339_v14  ;;  %v382_v19 = vrot.slane %v675_v7, 4  ;;  %v388_v20 = vrot.slane %v678_v8, 4  ;;  %v394_v21 = vrot.slane %v679_v10, 4 }
  0x87   : > { %v343_v22 = vsel %vm342_vm6, %v321_v61, %v341_v18  ;;  %v365_v23 = vadd.f32 %v670_v3, %v364_v15  ;;  %v371_v24 = vadd.f32 %v671_v4, %v370_v16  ;;  %v377_v25 = vadd.f32 %v674_v6, %v376_v17  ;;  %v347_v6 = vld [vmem:[#allocation3] sm:$0xff] }
  0x88   : > { %v345_v26 = vadd.f32 %v343_v22, %v257_v13  ;;  %v383_v27 = vadd.f32 %v675_v7, %v382_v19  ;;  %v389_v28 = vadd.f32 %v678_v8, %v388_v20  ;;  %v395_v29 = vadd.f32 %v679_v10, %v394_v21 }
  0x89   : > { %v366_v30 = vrot.slane %v365_v23, 2  ;;  %v372_v31 = vrot.slane %v371_v24, 2  ;;  %v378_v32 = vrot.slane %v377_v25, 2  ;;  %v400_v33 = vrot.slane %v682_v11, 4 }
  0x8a   : > { %346 = vst [vmem:[#allocation2] sm:$0xff] %v345_v26  ;;  %v384_v34 = vrot.slane %v383_v27, 2  ;;  %v390_v35 = vrot.slane %v389_v28, 2  ;;  %v396_v36 = vrot.slane %v395_v29, 2  ;;  %v406_v37 = vrot.slane %v683_v12, 4 }
  0x8b   : > { %v367_v38 = vadd.f32 %v366_v30, %v365_v23  ;;  %v373_v39 = vadd.f32 %v372_v31, %v371_v24  ;;  %v379_v40 = vadd.f32 %v378_v32, %v377_v25  ;;  %v401_v41 = vadd.f32 %v682_v11, %v400_v33 }
  0x8c   : > { %v385_v42 = vadd.f32 %v384_v34, %v383_v27  ;;  %v391_v43 = vadd.f32 %v390_v35, %v389_v28  ;;  %v397_v44 = vadd.f32 %v396_v36, %v395_v29  ;;  %v407_v45 = vadd.f32 %v683_v12, %v406_v37 }
  0x8d   : > { %v368_v46 = vrot.slane %v367_v38, 1  ;;  %v374_v47 = vrot.slane %v373_v39, 1  ;;  %v380_v48 = vrot.slane %v379_v40, 1  ;;  %v402_v49 = vrot.slane %v401_v41, 2 }
  0x8e   : > { %v386_v50 = vrot.slane %v385_v42, 1  ;;  %v392_v51 = vrot.slane %v391_v43, 1  ;;  %v398_v52 = vrot.slane %v397_v44, 1  ;;  %v408_v53 = vrot.slane %v407_v45, 2 }
  0x8f   : > { %v369_v54 = vadd.f32 %v368_v46, %v367_v38  ;;  %v375_v55 = vadd.f32 %v374_v47, %v373_v39  ;;  %v381_v56 = vadd.f32 %v380_v48, %v379_v40  ;;  %v403_v57 = vadd.f32 %v402_v49, %v401_v41 }
  0x90   : > { %v387_v58 = vadd.f32 %v386_v50, %v385_v42  ;;  %v393_v59 = vadd.f32 %v392_v51, %v391_v43  ;;  %v409_v60 = vadd.f32 %v408_v53, %v407_v45  ;;  %v399_v61 = vadd.f32 %v398_v52, %v397_v44  ;;  %v644_v53 = vld [vmem:[%s1345_s2] ss:$0 sm:$0xff] (!%p643_p6) }
  0x91   : > { %v404_v62 = vrot.slane %v403_v57, 1  ;;  %v420_v63 = vsel %vm330_vm0, %v375_v55, %v369_v54  ;;  %v434_v11 = vld [vmem:[#allocation2] sm:$0xff] (!%p643_p6) }
  0x92   : > { %v410_v0 = vrot.slane %v409_v60, 1  ;;  %v421_v1 = vsel %vm332_vm1, %v381_v56, %v420_v63  ;;  %v435_v13 = vmul.f32 (!%p643_p6), 0.0625, %v434_v11  ;;  %v645_v56 = vld [vmem:[%s1345_s2 + $0x1] ss:$0 sm:$0xff] (!%p643_p6) }
  0x93   : > { %v405_v2 = vadd.f32 %v404_v62, %v403_v57  ;;  %v422_v3 = vsel %vm334_vm2, %v387_v58, %v421_v1 }
  0x94   : > { %v411_v4 = vadd.f32 %v410_v0, %v409_v60  ;;  %v423_v5 = vsel %vm336_vm3, %v393_v59, %v422_v3  ;;  %433 = sbr.rel (%p643_p6) target bundleno = 519 (0x207), region = 48  ;;  %v438_v15 = vmul.f32 (!%p643_p6), %v435_v13, %v435_v13 }
  0x95   : > { %v424_v7 = vsel %vm338_vm4, %v399_v61, %v423_v5 }
  0x96   : > { %v425_v8 = vsel %vm340_vm5, %v405_v2, %v424_v7  ;;  %439 = vadd.xlane.f32.xlu0 (!%p643_p6), %v438_v15 }
  0x97   : > { %v426_v9 = vsel %vm342_vm6, %v411_v4, %v425_v8 }
  0x98   : > { %v428_v10 = vadd.f32 %v426_v9, %v347_v6 }
  0x9a   : > { %429 = vst [vmem:[#allocation3] sm:$0xff] %v428_v10 }
  0xa1   : > { %v436_v12 = vld [vmem:[#allocation3] sm:$0xff] }
  0xa2   : > { %v437_v14 = vmul.f32 0.0625, %v436_v12 }
  0xa4   : > { %v448_v16 = vmul.f32 %v437_v14, %v437_v14 }
  0xa6   : > { %449 = vadd.xlane.f32.xlu0 %v448_v16 }
 0x123   : > { %v440_v17 = vpop.xlane.xlu0 %439 }
 0x124   : > { %801 = vrsqrt.f32 %v440_v17  ;;  %vm443_vm7 = vcmp.eq.f32.partialorder %v440_v17, inf  ;;  %v446_v21 = vand.u32 2147483648, %v440_v17  ;;  %vm445_vm8 = vcmp.eq.f32.partialorder %v440_v17, 0.0 }
 0x12e   : > { %v802_v19 = vpop.eup %801 }
 0x12f   : > { %v442_v20 = vmul.f32 %v802_v19, %v440_v17 }
 0x131   : > { %v444_v22 = vsel %vm443_vm7, %v440_v17, %v442_v20 }
 0x132   : > { %v447_v24 = vsel %vm445_vm8, %v446_v21, %v444_v22 }
 0x133   : > { %v450_v18 = vpop.xlane.xlu0 %449  ;;  %v458_v26 = vmax.f32 %v447_v24, 1e-12 }
 0x134   : > { %803 = vrsqrt.f32 %v450_v18  ;;  %vm453_vm9 = vcmp.eq.f32.partialorder %v450_v18, inf  ;;  %v456_v27 = vand.u32 2147483648, %v450_v18  ;;  %vm455_vm10 = vcmp.eq.f32.partialorder %v450_v18, 0.0 }
 0x135   : > { %805 = vrcp.f32 %v458_v26 }
 0x13e   : > { %v804_v23 = vpop.eup %803 }
 0x13f   : > { %v452_v25 = vmul.f32 %v804_v23, %v450_v18  ;;  %v806_v31 = vpop.eup %805 }
 0x140   : > { %v460_v32 = vmul.f32 %v806_v31, %v435_v13 }
 0x141   : > { %v454_v28 = vsel %vm453_vm9, %v450_v18, %v452_v25 }
 0x142   : > { %v457_v29 = vsel %vm455_vm10, %v456_v27, %v454_v28  ;;  %v467_v33 = vmul.f32 %v460_v32, %v460_v32 }
 0x143   : > { %v461_v30 = vmax.f32 %v457_v29, 1e-12 }
 0x144   : > { %468 = vadd.xlane.f32.xlu1 %v467_v33 }
 0x145   : > { %807 = vrcp.f32 %v461_v30 }
 0x14f   : > { %v808_v34 = vpop.eup %807 }
 0x150   : > { %v463_v35 = vmul.f32 %v808_v34, %v437_v14 }
 0x152   : > { %v477_v36 = vmul.f32 %v463_v35, %v463_v35  ;;  %v464_v37 = vmul.f32 %v463_v35, %v460_v32 }
 0x154   : > { %478 = vadd.xlane.f32.xlu1 %v477_v36  ;;  %465 = vadd.xlane.f32.xlu0 %v464_v37 }
 0x1d1   : > { %v469_v38 = vpop.xlane.xlu1 %468 }
 0x1d2   : > { %809 = vrsqrt.f32 %v469_v38  ;;  %vm472_vm11 = vcmp.eq.f32.partialorder %v469_v38, inf  ;;  %v475_v45 = vand.u32 2147483648, %v469_v38  ;;  %vm474_vm13 = vcmp.eq.f32.partialorder %v469_v38, 0.0 }
 0x1dc   : > { %v810_v40 = vpop.eup %809 }
 0x1dd   : > { %v471_v41 = vmul.f32 %v810_v40, %v469_v38 }
 0x1df   : > { %v473_v43 = vsel %vm472_vm11, %v469_v38, %v471_v41 }
 0x1e0   : > { %v476_v48 = vsel %vm474_vm13, %v475_v45, %v473_v43 }
 0x1e1   : > { %v479_v39 = vpop.xlane.xlu1 %478  ;;  %v466_v54 = vpop.xlane.xlu0 %465 }
 0x1e2   : > { %811 = vrsqrt.f32 %v479_v39  ;;  %vm482_vm12 = vcmp.eq.f32.partialorder %v479_v39, inf  ;;  %v485_v46 = vand.u32 2147483648, %v479_v39  ;;  %vm484_vm14 = vcmp.eq.f32.partialorder %v479_v39, 0.0 }
 0x1ec   : > { %v812_v42 = vpop.eup %811 }
 0x1ed   : > { %v481_v44 = vmul.f32 %v812_v42, %v479_v39 }
 0x1ef   : > { %v483_v47 = vsel %vm482_vm12, %v479_v39, %v481_v44 }
 0x1f0   : > { %v486_v49 = vsel %vm484_vm14, %v485_v46, %v483_v47 }
 0x1f1   : > { %v487_v50 = vmul.f32 %v486_v49, %v476_v48 }
 0x1f3   : > { %v488_v51 = vmax.f32 %v487_v50, 1e-08 }
 0x1f5   : > { %813 = vrcp.f32 %v488_v51 }
 0x1ff   : > { %v814_v52 = vpop.eup %813 }
 0x200   : > { %v490_v55 = vmul.f32 %v814_v52, %v466_v54 }
 0x202   : > { %v496_v57 = vmul.f32 %v644_v53, %v490_v55 }
 0x204   : > { %v502_v58 = vadd.f32 %v645_v56, %v496_v57 }
 0x206   : > { %503 = vst [vmem:[%s248_s15] sm:$0xff] %v502_v58 }
 0x207 PF: > { %s647_s29 = sshll.u32 %s989_s19, 7  ;;  %s518_s28 = sshll.u32 %s248_s15, 4  ;;  %s519_s28 = int_to_ptr.vmem [resolvable:$true] %s518_s28 }
 0x208   : > { %s1283_s9 = scalar_lea.hbm %s1346_s3, %s647_s29  ;;  %s505_s0 = scalar_lea.sflag [#allocation6], %s246_s17 }
 0x209   : > { %s875_s30 = scalar_lea.vmem %s519_s28, 128  ;;  %p1374_p1 = scmp.ne.s32.totalorder %s1364_s7, 0 }
 0x20a   : > { %p876_p9 = scmp.ne.s32.totalorder %s519_s28, %s875_s30  ;;  %s1009_s27 = smov [#allocation9]  }
 0x20b   : > { %s879_s5 = sshll.u32 %s1009_s27, 4  ;;  %s880_s5 = int_to_ptr.vmem [resolvable:$false] %s879_s5 }
 0x20c   : > { %p877_p10 = pnand %p876_p9, %p1374_p1  ;;  %s881_s25 = scalar_lea.vmem %s880_s5, 256 }
 0x20d   : > { %p882_p12 = scmp.lt.s32.totalorder %s519_s28, %s880_s5  ;;  %p883_p2 = scmp.lt.s32.totalorder %s881_s25, %s875_s30 }
 0x20e   : > { %p878_p11 = pneg %p877_p10 }
 0x20f   : > { %p884_p13 = por %p883_p2, %p882_p12 }
 0x211   : > { %p885_p0 = pnand %p884_p13, %p878_p11 }
 0x213   : > { %888 = shalt.err (!%p885_p0)
}
 0x214   : > { %s889_s19 = scalar_lea.hbm %s1283_s9, 128  ;;  %s893_s17 = scalar_lea.hbm %s1346_s3, 256 }
 0x215   : > { %p890_p5 = scmp.ne.s32.totalorder %s1283_s9, %s889_s19  ;;  %p894_p7 = scmp.lt.u32.totalorder %s1283_s9, %s1346_s3 }
 0x216   : > { %p895_p4 = scmp.lt.u32.totalorder %s893_s17, %s889_s19  ;;  %p897_p9 = scmp.lt.u32.totalorder %s889_s19, %s1283_s9 }
 0x217   : > { %p891_p8 = pnand %p890_p5, %p1374_p1 }
 0x218   : > { %p896_p6 = por %p895_p4, %p894_p7 }
 0x219   : > { %p892_p3 = pneg %p891_p8 }
 0x21a   : > { %p898_p10 = por %p897_p9, %p896_p6 }
 0x21c   : > { %p899_p11 = pnand %p898_p10, %p892_p3 }
 0x21e   : > { %902 = shalt.err (!%p899_p11)
}
 0x21f   : > { %694 = dma.vmem_to_hbm [thread:$0]  (%p1374_p1), %s519_s28, 128, %s1283_s9, %s505_s0  }
 0x220 PF: > { %p708_p12 = scmp.ge.s32.totalorder %s1001_s22, 2  ;;  %s530_s18 = sand.u32 1, %s961_s12  }
 0x221   : > { %p1375_p2 = scmp.ne.s32.totalorder %s1366_s10, 0  ;;  %s531_s4 = scalar_lea.sflag [#allocation6], %s530_s18 }
 0x223   : > { %p704_p13 = pnand %p708_p12, %p1375_p2 }
 0x225   : > { %956 = dma.done.wait (!%p704_p13), %s531_s4, 128  }
 0x226   : > { %958 = vsyncadd (!%p704_p13), %s531_s4, 4294967168  ;;  %s22_s22 = sadd.s32 1, %s1001_s22   ;;  %s1376_s7 = sld [smem:[#allocation13_spill]] }
 0x227   : > { %p19_p0 = scmp.ge.s32.totalorder %s22_s22, 6   ;;  %s1377_s17 = sld [smem:[#allocation18_spill]] }
 0x228   : > { %s1378_s18 = sld [smem:[#allocation14_spill]]  ;;  %s1379_s19 = sld [smem:[#allocation15_spill]] }
 0x229   : > { %s1380_s20 = sld [smem:[#allocation16_spill]]  ;;  %s1381_s21 = sld [smem:[#allocation17_spill]] }
 0x22a   : > { %s1382_s12 = smov %s965_s13  ;;  %s1383_s13 = smov %s969_s14 }
 0x22b   : > { %s1384_s14 = smov %s1117_s8  ;;  %s1385_s15 = smov %s977_s16 }
 0x22c   : > { %s1386_s16 = smov %s1376_s7  ;;  %21 = sbr.rel (!%p19_p0) target bundleno = 13 (0xd), region = 98 }
 0x233   :  { %536 = vsyncpa [#allocation5], 1 }
 0x234   :  { %538 = vsyncpa [#allocation5 + $0x1], 1 }
 0x235   :  { %539 = vsyncpa [#allocation8], 1 }
 0x236   :  { %541 = vsyncpa [#allocation8 + $0x1], 1 }
 0x237   :  { %542 = vsyncpa [#allocation6], 1 }
 0x238   :  { %544 = vsyncpa [#allocation6 + $0x1], 1 }

</bundles_post_ra>
